<compile_context>
chip_gen: v7x
topology: tpu7x:2x2x1
jax: 0.10.0
libtpu: 0.0.40
codegen_flags: <defaults>
</compile_context>

<pallas_src>
import jax
import jax.numpy as jnp
from jax.experimental import pallas as pl
from jax.experimental.pallas import tpu as pltpu


def fast_triggs_kernel(r_ref, j_ref, r_out_ref, j_out_ref):
    # r_ref: (TN, D), j_ref: (TN, D*P) — lane-dense row per residual item.
    r = r_ref[...].astype(jnp.float32)
    c = jnp.sum(r * r, axis=-1, keepdims=True)           # (TN, 1)   c_i = R_i^T R_i
    # s_i = sqrt(rho'(c_i)); Cauchy(delta=1): rho(x)=log(1+x) => rho'(x)=1/(1+x)
    s = jax.lax.rsqrt(1.0 + c)                            # (TN, 1)   EUP rsqrt
    r_out_ref[...] = (s * r).astype(r_out_ref.dtype)      # R_i^rho = s_i * R_i
    j = j_ref[...].astype(jnp.float32)
    j_out_ref[...] = (s * j).astype(j_out_ref.dtype)      # J_i^rho = s_i * J_i  (bcast over D*P)


def fast_triggs(R, J, *, target_j_tile_bytes=4 << 20):
    """R: (N, D); J: (N*D, P). Returns (s*R, sj*J) matching the PyTorch module."""
    N, D = R.shape
    P = J.shape[-1]
    assert J.shape[0] == N * D
    DP = D * P
    itemsize = jnp.dtype(J.dtype).itemsize

    # Lane-dense view of the Jacobian: one contiguous row of D*P elements per residual item.
    J2 = J.reshape(N, DP)

    # Rows per tile: aim for a ~4 MiB J tile (mem-bound kernel; large tiles amortize the
    # per-grid-step overhead), rounded down to a multiple of 8 sublanes, capped at N
    # (rounded up to 8 so the sublane divisibility constraint always holds).
    tn = max(8, (target_j_tile_bytes // max(DP * itemsize, 1)) // 8 * 8)
    n_pad8 = ((N + 7) // 8) * 8
    tn = min(tn, n_pad8)

    # Pad N up to a multiple of tn instead of collapsing to a single block: zero-padded rows
    # give c=0, s=1, zero outputs, and are sliced off below. Keeps pipelining + megacore alive.
    Np = ((N + tn - 1) // tn) * tn
    if Np != N:
        R_p = jnp.pad(R, ((0, Np - N), (0, 0)))
        J_p = jnp.pad(J2, ((0, Np - N), (0, 0)))
    else:
        R_p, J_p = R, J2

    cost = pl.CostEstimate(
        flops=2 * N * D * (P + 1),
        transcendentals=N,                                  # one rsqrt per residual item
        bytes_accessed=2 * (N * D + N * DP) * itemsize,     # read + write of R and J
    )

    r_out, j_out = pl.pallas_call(
        fast_triggs_kernel,
        out_shape=(
            jax.ShapeDtypeStruct((Np, D), R.dtype),
            jax.ShapeDtypeStruct((Np, DP), J.dtype),
        ),
        grid_spec=pltpu.PrefetchScalarGridSpec(
            num_scalar_prefetch=0,
            grid=(Np // tn,),
            in_specs=[
                pl.BlockSpec((tn, D), lambda i: (i, 0)),
                pl.BlockSpec((tn, DP), lambda i: (i, 0)),
            ],
            out_specs=[
                pl.BlockSpec((tn, D), lambda i: (i, 0)),
                pl.BlockSpec((tn, DP), lambda i: (i, 0)),
            ],
        ),
        compiler_params=pltpu.CompilerParams(dimension_semantics=("parallel",)),
        cost_estimate=cost,
    )(R_p, J_p)

    if Np != N:
        r_out = r_out[:N]
        j_out = j_out[:N]
    return r_out, j_out.reshape(N * D, P)


def fast_triggs_ref(R, J):
    """Pure-JAX reference mirroring the PyTorch forward (Cauchy kernel, delta=1)."""
    c = jnp.sum(R * R, axis=-1, keepdims=True)
    s = jnp.sqrt(1.0 / (1.0 + c))                 # sqrt(rho'(c))
    sj = jnp.broadcast_to(s, R.shape).reshape(-1, 1)
    return s * R, sj * J


if __name__ == "__main__":
    key = jax.random.PRNGKey(0)
    kr, kj, kr2, kj2 = jax.random.split(key, 4)

    # Case 1: divisible N
    N, D, P = 64, 4, 8                            # residual items, residual dim, param dim
    R = jax.random.normal(kr, (N, D), dtype=jnp.float32)
    J = jax.random.normal(kj, (N * D, P), dtype=jnp.float32)

    r_out, j_out = fast_triggs(R, J)
    jax.block_until_ready((r_out, j_out))
    r_ref, j_ref = fast_triggs_ref(R, J)
    assert r_out.shape == R.shape and j_out.shape == J.shape
    assert jnp.allclose(r_out, r_ref, atol=1e-5, rtol=1e-5)
    assert jnp.allclose(j_out, j_ref, atol=1e-5, rtol=1e-5)

    # Case 2: N not a multiple of 8 exercises the padding path (no single-block fallback)
    N2 = 50
    R2 = jax.random.normal(kr2, (N2, D), dtype=jnp.float32)
    J2 = jax.random.normal(kj2, (N2 * D, P), dtype=jnp.float32)

    r_out2, j_out2 = fast_triggs(R2, J2)
    jax.block_until_ready((r_out2, j_out2))
    r_ref2, j_ref2 = fast_triggs_ref(R2, J2)
    assert r_out2.shape == R2.shape and j_out2.shape == J2.shape
    assert jnp.allclose(r_out2, r_ref2, atol=1e-5, rtol=1e-5)
    assert jnp.allclose(j_out2, j_ref2, atol=1e-5, rtol=1e-5)

    print("KERNEL_OK")
</pallas_src>

<mosaic_0001>
module attributes {stable_mosaic.version = 11 : i64} {
  func.func @fast_triggs_kernel(%arg0: i32, %arg1: memref<64x4xf32, #tpu.memory_space<vmem>>, %arg2: memref<64x32xf32, #tpu.memory_space<vmem>>, %arg3: memref<64x4xf32, #tpu.memory_space<vmem>>, %arg4: memref<64x32xf32, #tpu.memory_space<vmem>>) attributes {dimension_semantics = [#tpu.dimension_semantics<parallel>], iteration_bounds = array<i64: 1>, scalar_prefetch = 0 : i64, scratch_operands = 0 : i64, tpu.core_type = #tpu.core_type<tc>, window_params = [{transform_indices = @transform_0, window_bounds = array<i64: 64, 4>}, {transform_indices = @transform_1, window_bounds = array<i64: 64, 32>}, {transform_indices = @transform_2, window_bounds = array<i64: 64, 4>}, {transform_indices = @transform_3, window_bounds = array<i64: 64, 32>}]} {
    %c0 = arith.constant 0 : index
    %c0_0 = arith.constant 0 : index
    %0 = vector.load %arg1[%c0, %c0_0] : memref<64x4xf32, #tpu.memory_space<vmem>>, vector<64x4xf32>
    %1 = arith.mulf %0, %0 : vector<64x4xf32>
    %cst = arith.constant dense<0.000000e+00> : vector<64xf32>
    %2 = vector.multi_reduction <add>, %1, %cst [1] : vector<64x4xf32> to vector<64xf32>
    %3 = vector.shape_cast %2 : vector<64xf32> to vector<64x1xf32>
    %cst_1 = arith.constant 1.000000e+00 : f32
    %4 = vector.broadcast %cst_1 : f32 to vector<64x1xf32>
    %5 = arith.addf %4, %3 : vector<64x1xf32>
    %6 = math.rsqrt %5 : vector<64x1xf32>
    %7 = vector.broadcast %6 : vector<64x1xf32> to vector<64x4xf32>
    %8 = arith.mulf %7, %0 : vector<64x4xf32>
    %c0_2 = arith.constant 0 : index
    %c0_3 = arith.constant 0 : index
    %9 = vector.load %arg3[%c0_2, %c0_3] : memref<64x4xf32, #tpu.memory_space<vmem>>, vector<64x4xf32>
    tpu.vector_store %arg3[%c0_2, %c0_3], %8 {strides = array<i32>} : memref<64x4xf32, #tpu.memory_space<vmem>>, vector<64x4xf32>,
    %c0_4 = arith.constant 0 : index
    %c0_5 = arith.constant 0 : index
    %10 = vector.load %arg2[%c0_4, %c0_5] : memref<64x32xf32, #tpu.memory_space<vmem>>, vector<64x32xf32>
    %11 = vector.broadcast %6 : vector<64x1xf32> to vector<64x32xf32>
    %12 = arith.mulf %11, %10 : vector<64x32xf32>
    %c0_6 = arith.constant 0 : index
    %c0_7 = arith.constant 0 : index
    %13 = vector.load %arg4[%c0_6, %c0_7] : memref<64x32xf32, #tpu.memory_space<vmem>>, vector<64x32xf32>
    tpu.vector_store %arg4[%c0_6, %c0_7], %12 {strides = array<i32>} : memref<64x32xf32, #tpu.memory_space<vmem>>, vector<64x32xf32>,
    return
  }
  func.func @transform_0(%arg0: i32) -> (i32, i32) {
    %c0_i32 = arith.constant 0 : i32
    %c0_i32_0 = arith.constant 0 : i32
    return %arg0, %c0_i32 : i32, i32
  }
  func.func @transform_1(%arg0: i32) -> (i32, i32) {
    %c0_i32 = arith.constant 0 : i32
    %c0_i32_0 = arith.constant 0 : i32
    return %arg0, %c0_i32 : i32, i32
  }
  func.func @transform_2(%arg0: i32) -> (i32, i32) {
    %c0_i32 = arith.constant 0 : i32
    %c0_i32_0 = arith.constant 0 : i32
    return %arg0, %c0_i32 : i32, i32
  }
  func.func @transform_3(%arg0: i32) -> (i32, i32) {
    %c0_i32 = arith.constant 0 : i32
    %c0_i32_0 = arith.constant 0 : i32
    return %arg0, %c0_i32 : i32, i32
  }
}

</mosaic_0001>

<bundles_post_ra>
// kernel: tpu_custom_call.1
= control target key start
LH: loop header
LB: loop body
LE: loop exit
PB: predicated region body
PF: predicated region fallthrough
CT: control target
= control target key end

     0   :  { %vm29_vm0 = vcmask 31744   ;;  %vm102_vm1 = vcmask 261120   ;;  %s315_s0 = inlined_call_operand.vmem [shape: f32[64,4], index: 0, kind: input, shape index: {}]   ;;  %s316_s1 = inlined_call_operand.vmem [shape: f32[64,32], index: 1, kind: input, shape index: {}]   ;;  %s317_s2 = inlined_call_operand.vmem [shape: f32[64,4], index: 2, kind: output, shape index: {0}]   ;;  %s318_s3 = inlined_call_operand.vmem [shape: f32[64,32], index: 3, kind: output, shape index: {1}]  }
   0x1   :  { %v158_v0 = vld [vmem:[%s315_s0 + $0x10] sm:$0xff]  ;;  %v163_v1 = vld [vmem:[%s315_s0] sm:$0xff]  ;;  %v168_v2 = vld [vmem:[%s315_s0 + $0x18] sm:$0xff] }
   0x2   :  { %v23_v3 = vmul.f32 %v158_v0, %v158_v0  ;;  %v21_v4 = vmul.f32 %v163_v1, %v163_v1  ;;  %v24_v5 = vmul.f32 %v168_v2, %v168_v2  ;;  %v179_v6 = vld [vmem:[%s315_s0 + $0x8] sm:$0xff]  ;;  %v191_v9 = vld [vmem:[%s315_s0 + $0x20] sm:$0xff]  ;;  %v204_v16 = vld [vmem:[%s315_s0 + $0x38] sm:$0xff] }
   0x3   :  { %v22_v7 = vmul.f32 %v179_v6, %v179_v6  ;;  %v186_v8 = vld [vmem:[%s315_s0 + $0x28] sm:$0xff]  ;;  %v25_v15 = vmul.f32 %v191_v9, %v191_v9  ;;  %v209_v17 = vld [vmem:[%s315_s0 + $0x30] sm:$0xff]  ;;  %v28_v20 = vmul.f32 %v204_v16, %v204_v16  ;;  %v86_v37 = vld [vmem:[%s316_s1] sm:$0xff] }
   0x4   :  { %v36_v10 = vsel %vm29_vm0, %v23_v3, 0.0  ;;  %v30_v11 = vsel %vm29_vm0, %v21_v4, 0.0  ;;  %v39_v12 = vsel %vm29_vm0, %v24_v5, 0.0  ;;  %v26_v14 = vmul.f32 %v186_v8, %v186_v8  ;;  %v88_v36 = vld [vmem:[%s316_s1 + $0x10] sm:$0xff]  ;;  %v89_v48 = vld [vmem:[%s316_s1 + $0x18] sm:$0xff]  ;;  %v87_v49 = vld [vmem:[%s316_s1 + $0x8] sm:$0xff] }
   0x5   :  { %37 = vadd.xlane.f32.xlu1 %v36_v10  ;;  %31 = vadd.xlane.f32.xlu0 %v30_v11  ;;  %v33_v13 = vsel %vm29_vm0, %v22_v7, 0.0  ;;  %v42_v19 = vsel %vm29_vm0, %v25_v15, 0.0  ;;  %v27_v21 = vmul.f32 %v209_v17, %v209_v17  ;;  %v51_v22 = vsel %vm29_vm0, %v28_v20, 0.0  ;;  %v91_v56 = vld [vmem:[%s316_s1 + $0x28] sm:$0xff]  ;;  %v90_v57 = vld [vmem:[%s316_s1 + $0x20] sm:$0xff] }
   0x6   :  { %v45_v18 = vsel %vm29_vm0, %v26_v14, 0.0 }
   0x7   :  { %v48_v23 = vsel %vm29_vm0, %v27_v21, 0.0 }
   0x9   :  { %40 = vadd.xlane.f32.xlu1 %v39_v12  ;;  %34 = vadd.xlane.f32.xlu0 %v33_v13 }
   0xd   :  { %46 = vadd.xlane.f32.xlu1 %v45_v18  ;;  %43 = vadd.xlane.f32.xlu0 %v42_v19 }
  0x11   :  { %52 = vadd.xlane.f32.xlu1 %v51_v22  ;;  %49 = vadd.xlane.f32.xlu0 %v48_v23 }
  0x92   :  { %v38_v24 = vpop.xlane.xlu1 %37  ;;  %v32_v25 = vpop.xlane.xlu0 %31 }
  0x93   :  { %v56_v26 = vadd.f32 1.0, %v38_v24  ;;  %v54_v27 = vadd.f32 1.0, %v32_v25 }
  0x95   :  { %119 = vrsqrt.f32 %v56_v26 }
  0x96   :  { %121 = vrsqrt.f32 %v54_v27  ;;  %v41_v28 = vpop.xlane.xlu1 %40  ;;  %v35_v29 = vpop.xlane.xlu0 %34 }
  0x97   :  { %v57_v30 = vadd.f32 1.0, %v41_v28  ;;  %v55_v31 = vadd.f32 1.0, %v35_v29 }
  0x99   :  { %123 = vrsqrt.f32 %v57_v30 }
  0x9a   :  { %125 = vrsqrt.f32 %v55_v31  ;;  %v47_v32 = vpop.xlane.xlu1 %46  ;;  %v44_v33 = vpop.xlane.xlu0 %43 }
  0x9b   :  { %v59_v34 = vadd.f32 1.0, %v47_v32  ;;  %v58_v35 = vadd.f32 1.0, %v44_v33 }
  0x9d   :  { %127 = vrsqrt.f32 %v59_v34 }
  0x9e   :  { %129 = vrsqrt.f32 %v58_v35  ;;  %v53_v38 = vpop.xlane.xlu1 %52  ;;  %v50_v39 = vpop.xlane.xlu0 %49 }
  0x9f   :  { %v120_v40 = vpop.eup %119  ;;  %v61_v41 = vadd.f32 1.0, %v53_v38  ;;  %v60_v42 = vadd.f32 1.0, %v50_v39 }
  0xa0   :  { %v122_v43 = vpop.eup %121  ;;  %v72_v44 = vmul.f32 %v120_v40, %v158_v0  ;;  %v96_v45 = vmul.f32 %v120_v40, %v88_v36  ;;  %v93_v0 = vld [vmem:[%s316_s1 + $0x38] sm:$0xff] }
  0xa1   :  { %v70_v46 = vmul.f32 %v122_v43, %v163_v1  ;;  %v94_v47 = vmul.f32 %v122_v43, %v86_v37  ;;  %131 = vrsqrt.f32 %v61_v41  ;;  %v92_v1 = vld [vmem:[%s316_s1 + $0x30] sm:$0xff] }
  0xa2   :  { %80 = vst.msk [vmem:[%s317_s2 + $0x10] sm:$0xff] %vm29_vm0, %v72_v44  ;;  %133 = vrsqrt.f32 %v60_v42 }
  0xa3   :  { %105 = vst.msk [vmem:[%s318_s3 + $0x10] sm:$0xff] %vm102_vm1, %v96_v45  ;;  %v124_v50 = vpop.eup %123  ;;  %103 = vst.msk [vmem:[%s318_s3] sm:$0xff] %vm102_vm1, %v94_v47 }
  0xa4   :  { %78 = vst.msk [vmem:[%s317_s2] sm:$0xff] %vm29_vm0, %v70_v46  ;;  %v126_v51 = vpop.eup %125  ;;  %v73_v52 = vmul.f32 %v124_v50, %v168_v2  ;;  %v97_v53 = vmul.f32 %v124_v50, %v89_v48 }
  0xa5   :  { %v71_v54 = vmul.f32 %v126_v51, %v179_v6  ;;  %v95_v55 = vmul.f32 %v126_v51, %v87_v49 }
  0xa6   :  { %81 = vst.msk [vmem:[%s317_s2 + $0x18] sm:$0xff] %vm29_vm0, %v73_v52 }
  0xa7   :  { %106 = vst.msk [vmem:[%s318_s3 + $0x18] sm:$0xff] %vm102_vm1, %v97_v53  ;;  %v128_v58 = vpop.eup %127  ;;  %104 = vst.msk [vmem:[%s318_s3 + $0x8] sm:$0xff] %vm102_vm1, %v95_v55 }
  0xa8   :  { %79 = vst.msk [vmem:[%s317_s2 + $0x8] sm:$0xff] %vm29_vm0, %v71_v54  ;;  %v130_v59 = vpop.eup %129  ;;  %v75_v60 = vmul.f32 %v128_v58, %v186_v8  ;;  %v99_v61 = vmul.f32 %v128_v58, %v91_v56 }
  0xa9   :  { %v74_v62 = vmul.f32 %v130_v59, %v191_v9  ;;  %v98_v63 = vmul.f32 %v130_v59, %v90_v57 }
  0xaa   :  { %83 = vst.msk [vmem:[%s317_s2 + $0x28] sm:$0xff] %vm29_vm0, %v75_v60 }
  0xab   :  { %108 = vst.msk [vmem:[%s318_s3 + $0x28] sm:$0xff] %vm102_vm1, %v99_v61  ;;  %v132_v2 = vpop.eup %131  ;;  %107 = vst.msk [vmem:[%s318_s3 + $0x20] sm:$0xff] %vm102_vm1, %v98_v63 }
  0xac   :  { %82 = vst.msk [vmem:[%s317_s2 + $0x20] sm:$0xff] %vm29_vm0, %v74_v62  ;;  %v134_v3 = vpop.eup %133  ;;  %v77_v4 = vmul.f32 %v132_v2, %v204_v16  ;;  %v101_v5 = vmul.f32 %v132_v2, %v93_v0 }
  0xad   :  { %v76_v6 = vmul.f32 %v134_v3, %v209_v17  ;;  %v100_v7 = vmul.f32 %v134_v3, %v92_v1 }
  0xae   :  { %85 = vst.msk [vmem:[%s317_s2 + $0x38] sm:$0xff] %vm29_vm0, %v77_v4 }
  0xaf   :  { %110 = vst.msk [vmem:[%s318_s3 + $0x38] sm:$0xff] %vm102_vm1, %v101_v5  ;;  %109 = vst.msk [vmem:[%s318_s3 + $0x30] sm:$0xff] %vm102_vm1, %v100_v7 }
  0xb0   :  { %84 = vst.msk [vmem:[%s317_s2 + $0x30] sm:$0xff] %vm29_vm0, %v76_v6 }

</bundles_post_ra>
